<compile_context>
chip_gen: v7x
topology: tpu7x:2x2x1
jax: 0.10.0
libtpu: 0.0.40
codegen_flags: <defaults>
</compile_context>

<pallas_src>
import jax
import jax.numpy as jnp
from jax.experimental import pallas as pl
from jax.experimental.pallas import tpu as pltpu

IN_FEATURES = 5
OUT_FEATURES = 6
IN_PAD = 8       # sublane-aligned contraction dim
OUT_PAD = 128    # lane-dense output dim


def _round_up(x, m):
    return (x + m - 1) // m * m


def _linear_kernel(x_ref, wt_ref, b_ref, o_ref):
    """o = x @ W^T + b, computed as K broadcast FMAs on the VPU.

    x_ref  : [TB, IN_PAD]   (rows >= IN_FEATURES are zero padding)
    wt_ref : [IN_PAD, OUT_PAD]  (pre-transposed, zero-padded weight)
    b_ref  : [1, OUT_PAD]
    o_ref  : [TB, OUT_PAD]
    """
    x = x_ref[...].astype(jnp.float32)
    w = wt_ref[...].astype(jnp.float32)
    b = b_ref[...].astype(jnp.float32)

    # 5-wide contraction: cheaper on the VPU than an MXU push at this size.
    acc = x[:, 0:1] * w[0:1, :] + b            # broadcasts to [TB, OUT_PAD]
    for k in range(1, IN_FEATURES):            # static unroll, K = 5
        acc = acc + x[:, k:k + 1] * w[k:k + 1, :]

    o_ref[...] = acc.astype(o_ref.dtype)


def prepare_params(weight, bias):
    """One-time parameter prep (do NOT redo per call): pad + transpose."""
    wt = jnp.zeros((IN_PAD, OUT_PAD), dtype=jnp.float32)
    wt = wt.at[:IN_FEATURES, :OUT_FEATURES].set(weight.T)
    b = jnp.zeros((1, OUT_PAD), dtype=jnp.float32)
    b = b.at[0, :OUT_FEATURES].set(bias)
    return wt, b


def model_forward(x1, wt_pad, b_pad, x2=None, *, tb=512):
    """Mirrors Model.forward. The torch forward returns None and discards v2,
    so x2 is accepted for interface parity but contributes no work (dead value
    per the spec; not computed, not stored). We return v1 so callers can
    block on / inspect the kernel result."""
    del x2  # v2 = v1 + x2 is discarded by the torch module -> dead work.

    B = x1.shape[0]
    TB = min(tb, _round_up(B, 8))
    Bp = _round_up(B, TB)

    # Pad batch rows (to the tile) and the contraction dim (5 -> 8).
    x1p = jnp.zeros((Bp, IN_PAD), dtype=x1.dtype)
    x1p = x1p.at[:B, :IN_FEATURES].set(x1)

    out = pl.pallas_call(
        _linear_kernel,
        out_shape=jax.ShapeDtypeStruct((Bp, OUT_PAD), x1.dtype),
        grid=(Bp // TB,),
        in_specs=[
            pl.BlockSpec((TB, IN_PAD), lambda i: (i, 0)),       # x1 tile
            pl.BlockSpec((IN_PAD, OUT_PAD), lambda i: (0, 0)),  # whole weight
            pl.BlockSpec((1, OUT_PAD), lambda i: (0, 0)),       # whole bias
        ],
        out_specs=pl.BlockSpec((TB, OUT_PAD), lambda i: (i, 0)),
        compiler_params=pltpu.CompilerParams(
            dimension_semantics=("parallel",),
            vmem_limit_bytes=32 * 1024 * 1024,
        ),
    )(x1p, wt_pad, b_pad)

    # Slice the lane-dense slab back to the real [B, 6] result.
    return out[:B, :OUT_FEATURES]


if __name__ == "__main__":
    key = jax.random.PRNGKey(0)
    k_x, k_w, k_b, k_x2 = jax.random.split(key, 4)

    B = 8  # small batch
    x1 = jax.random.normal(k_x, (B, IN_FEATURES), dtype=jnp.float32)
    # Deterministic parameter init (torch-Linear-like uniform bound).
    bound = 1.0 / (IN_FEATURES ** 0.5)
    weight = jax.random.uniform(k_w, (OUT_FEATURES, IN_FEATURES),
                                minval=-bound, maxval=bound, dtype=jnp.float32)
    bias = jax.random.uniform(k_b, (OUT_FEATURES,),
                              minval=-bound, maxval=bound, dtype=jnp.float32)
    x2 = jax.random.normal(k_x2, (B, OUT_FEATURES), dtype=jnp.float32)

    # One-time parameter prep (padding + transpose outside the hot path).
    wt_pad, b_pad = prepare_params(weight, bias)

    # Path 1: no x2 kwarg.
    v1 = model_forward(x1, wt_pad, b_pad)
    v1 = jax.block_until_ready(v1)

    # Path 2: x2 kwarg present — per the torch module, v2 = v1 + x2 is
    # discarded, so the kernel does no extra work for it.
    v1b = model_forward(x1, wt_pad, b_pad, x2=x2)
    v1b = jax.block_until_ready(v1b)

    # Correctness check against plain JAX reference.
    ref_v1 = x1 @ weight.T + bias
    assert jnp.allclose(v1, ref_v1, atol=1e-5), "v1 mismatch (no-x2 path)"
    assert jnp.allclose(v1b, ref_v1, atol=1e-5), "v1 mismatch (x2 path)"

    print("KERNEL_OK")
</pallas_src>

<mosaic_0001>
module attributes {stable_mosaic.version = 11 : i64} {
  func.func @_linear_kernel(%arg0: i32, %arg1: memref<8x8xf32, #tpu.memory_space<vmem>>, %arg2: memref<8x128xf32, #tpu.memory_space<vmem>>, %arg3: memref<1x128xf32, #tpu.memory_space<vmem>>, %arg4: memref<8x128xf32, #tpu.memory_space<vmem>>) attributes {dimension_semantics = [#tpu.dimension_semantics<parallel>], iteration_bounds = array<i64: 1>, scalar_prefetch = 0 : i64, scratch_operands = 0 : i64, tpu.core_type = #tpu.core_type<tc>, window_params = [{transform_indices = @transform_0, window_bounds = array<i64: 8, 8>}, {pipeline_mode = #tpu.pipeline_mode<synchronous>, transform_indices = @transform_1, window_bounds = array<i64: 8, 128>}, {pipeline_mode = #tpu.pipeline_mode<synchronous>, transform_indices = @transform_2, window_bounds = array<i64: 1, 128>}, {transform_indices = @transform_3, window_bounds = array<i64: 8, 128>}]} {
    %c0 = arith.constant 0 : index
    %c0_0 = arith.constant 0 : index
    %0 = vector.load %arg1[%c0, %c0_0] : memref<8x8xf32, #tpu.memory_space<vmem>>, vector<8x8xf32>
    %c0_1 = arith.constant 0 : index
    %c0_2 = arith.constant 0 : index
    %1 = vector.load %arg2[%c0_1, %c0_2] : memref<8x128xf32, #tpu.memory_space<vmem>>, vector<8x128xf32>
    %c0_3 = arith.constant 0 : index
    %c0_4 = arith.constant 0 : index
    %2 = vector.load %arg3[%c0_3, %c0_4] : memref<1x128xf32, #tpu.memory_space<vmem>>, vector<1x128xf32>
    %3 = vector.extract_strided_slice %0 {offsets = [0, 0], sizes = [8, 1], strides = [1, 1]} : vector<8x8xf32> to vector<8x1xf32>
    %4 = vector.extract_strided_slice %1 {offsets = [0, 0], sizes = [1, 128], strides = [1, 1]} : vector<8x128xf32> to vector<1x128xf32>
    %5 = vector.broadcast %3 : vector<8x1xf32> to vector<8x128xf32>
    %6 = vector.broadcast %4 : vector<1x128xf32> to vector<8x128xf32>
    %7 = arith.mulf %5, %6 : vector<8x128xf32>
    %8 = vector.broadcast %2 : vector<1x128xf32> to vector<8x128xf32>
    %9 = arith.addf %7, %8 : vector<8x128xf32>
    %10 = vector.extract_strided_slice %0 {offsets = [0, 1], sizes = [8, 1], strides = [1, 1]} : vector<8x8xf32> to vector<8x1xf32>
    %11 = vector.extract_strided_slice %1 {offsets = [1, 0], sizes = [1, 128], strides = [1, 1]} : vector<8x128xf32> to vector<1x128xf32>
    %12 = vector.broadcast %10 : vector<8x1xf32> to vector<8x128xf32>
    %13 = vector.broadcast %11 : vector<1x128xf32> to vector<8x128xf32>
    %14 = arith.mulf %12, %13 : vector<8x128xf32>
    %15 = arith.addf %9, %14 : vector<8x128xf32>
    %16 = vector.extract_strided_slice %0 {offsets = [0, 2], sizes = [8, 1], strides = [1, 1]} : vector<8x8xf32> to vector<8x1xf32>
    %17 = vector.extract_strided_slice %1 {offsets = [2, 0], sizes = [1, 128], strides = [1, 1]} : vector<8x128xf32> to vector<1x128xf32>
    %18 = vector.broadcast %16 : vector<8x1xf32> to vector<8x128xf32>
    %19 = vector.broadcast %17 : vector<1x128xf32> to vector<8x128xf32>
    %20 = arith.mulf %18, %19 : vector<8x128xf32>
    %21 = arith.addf %15, %20 : vector<8x128xf32>
    %22 = vector.extract_strided_slice %0 {offsets = [0, 3], sizes = [8, 1], strides = [1, 1]} : vector<8x8xf32> to vector<8x1xf32>
    %23 = vector.extract_strided_slice %1 {offsets = [3, 0], sizes = [1, 128], strides = [1, 1]} : vector<8x128xf32> to vector<1x128xf32>
    %24 = vector.broadcast %22 : vector<8x1xf32> to vector<8x128xf32>
    %25 = vector.broadcast %23 : vector<1x128xf32> to vector<8x128xf32>
    %26 = arith.mulf %24, %25 : vector<8x128xf32>
    %27 = arith.addf %21, %26 : vector<8x128xf32>
    %28 = vector.extract_strided_slice %0 {offsets = [0, 4], sizes = [8, 1], strides = [1, 1]} : vector<8x8xf32> to vector<8x1xf32>
    %29 = vector.extract_strided_slice %1 {offsets = [4, 0], sizes = [1, 128], strides = [1, 1]} : vector<8x128xf32> to vector<1x128xf32>
    %30 = vector.broadcast %28 : vector<8x1xf32> to vector<8x128xf32>
    %31 = vector.broadcast %29 : vector<1x128xf32> to vector<8x128xf32>
    %32 = arith.mulf %30, %31 : vector<8x128xf32>
    %33 = arith.addf %27, %32 : vector<8x128xf32>
    %c0_5 = arith.constant 0 : index
    %c0_6 = arith.constant 0 : index
    %34 = vector.load %arg4[%c0_5, %c0_6] : memref<8x128xf32, #tpu.memory_space<vmem>>, vector<8x128xf32>
    tpu.vector_store %arg4[%c0_5, %c0_6], %33 {strides = array<i32>} : memref<8x128xf32, #tpu.memory_space<vmem>>, vector<8x128xf32>,
    return
  }
  func.func @transform_0(%arg0: i32) -> (i32, i32) {
    %c0_i32 = arith.constant 0 : i32
    %c0_i32_0 = arith.constant 0 : i32
    return %arg0, %c0_i32 : i32, i32
  }
  func.func @transform_1(%arg0: i32) -> (i32, i32) {
    %c0_i32 = arith.constant 0 : i32
    %c0_i32_0 = arith.constant 0 : i32
    %c0_i32_1 = arith.constant 0 : i32
    return %c0_i32, %c0_i32_0 : i32, i32
  }
  func.func @transform_2(%arg0: i32) -> (i32, i32) {
    %c0_i32 = arith.constant 0 : i32
    %c0_i32_0 = arith.constant 0 : i32
    %c0_i32_1 = arith.constant 0 : i32
    return %c0_i32, %c0_i32_0 : i32, i32
  }
  func.func @transform_3(%arg0: i32) -> (i32, i32) {
    %c0_i32 = arith.constant 0 : i32
    %c0_i32_0 = arith.constant 0 : i32
    return %arg0, %c0_i32 : i32, i32
  }
}

</mosaic_0001>

<bundles_post_ra>
// kernel: tpu_custom_call.1
= control target key start
LH: loop header
LB: loop body
LE: loop exit
PB: predicated region body
PF: predicated region fallthrough
CT: control target
= control target key end

     0   :  { %8 = vsyncpa [#allocation3], 0  ;;  %s270_s0 = inlined_call_operand.hbm [shape: f32[8,8], index: 0, kind: input, shape index: {}]   ;;  %s271_s1 = inlined_call_operand.hbm [shape: f32[8,128], index: 1, kind: input, shape index: {}]   ;;  %s272_s2 = inlined_call_operand.vmem [shape: f32[1,128], index: 2, kind: input, shape index: {}]   ;;  %s273_s3 = inlined_call_operand.hbm [shape: f32[8,128], index: 3, kind: output, shape index: {}]  }
   0x1   :  { %9 = vsyncpa [#allocation6], 0 }
   0x2   :  { %10 = vsyncpa [#allocation4], 0  ;;  %s203_s12 = smov [#allocation2]   ;;  %s204_s14 = smov [#allocation5]  }
   0x3   :  { %s17_s13 = sshll.u32 %s203_s12, 4  ;;  %s27_s15 = sshll.u32 %s204_s14, 4  ;;  %s18_s13 = int_to_ptr.vmem [resolvable:$true] %s17_s13  ;;  %s28_s15 = int_to_ptr.vmem [resolvable:$true] %s27_s15 }
   0x4   :  { %s131_s18 = scalar_lea.hbm %s270_s0, 128 }
   0x5   :  { %p132_p0 = scmp.ne.s32.totalorder %s270_s0, %s131_s18  ;;  %p135_p1 = scmp.lt.u32.totalorder %s131_s18, %s270_s0 }
   0x7   :  { %p137_p2 = pnand %p135_p1, %p132_p0 }
   0x9   :  { %140 = shalt.err (!%p137_p2)
}
   0xa   :  { %s141_s23 = scalar_lea.vmem %s18_s13, 128  ;;  %p146_p4 = scmp.lt.s32.totalorder %s18_s13, %s18_s13 }
   0xb   :  { %p142_p3 = scmp.ne.s32.totalorder %s18_s13, %s141_s23  ;;  %p147_p5 = scmp.lt.s32.totalorder %s141_s23, %s141_s23 }
   0xd   :  { %p148_p6 = por %p147_p5, %p146_p4 }
   0xf   :  { %p149_p7 = pnand %p148_p6, %p142_p3 }
  0x11   :  { %152 = shalt.err (!%p149_p7)
}
  0x12   :  { %20 = dma.hbm_to_vmem [thread:$0]  %s270_s0, 128, %s18_s13, [#allocation3]  }
  0x13   :  { %s153_s28 = scalar_lea.hbm %s271_s1, 128 }
  0x14   :  { %p154_p8 = scmp.ne.s32.totalorder %s271_s1, %s153_s28  ;;  %p157_p9 = scmp.lt.u32.totalorder %s153_s28, %s271_s1 }
  0x16   :  { %p159_p10 = pnand %p157_p9, %p154_p8 }
  0x18   :  { %162 = shalt.err (!%p159_p10)
}
  0x19   :  { %s163_s6 = scalar_lea.vmem %s28_s15, 128  ;;  %p168_p12 = scmp.lt.s32.totalorder %s28_s15, %s28_s15 }
  0x1a   :  { %p164_p11 = scmp.ne.s32.totalorder %s28_s15, %s163_s6  ;;  %p169_p13 = scmp.lt.s32.totalorder %s163_s6, %s163_s6 }
  0x1c   :  { %p170_p0 = por %p169_p13, %p168_p12 }
  0x1e   :  { %p171_p1 = pnand %p170_p0, %p164_p11 }
  0x20   :  { %174 = shalt.err (!%p171_p1)
}
  0x21   :  { %30 = dma.hbm_to_vmem [thread:$0]  %s271_s1, 128, %s28_s15, [#allocation6]  }
  0x22   :  { %197 = dma.done.wait [#allocation3], 128  }
  0x23   :  { %198 = vsyncadd [#allocation3], 4294967168 }
  0x24   :  { %199 = dma.done.wait [#allocation6], 128  }
  0x25   :  { %200 = vsyncadd [#allocation6], 4294967168  ;;  %v205_v0 = vmov 0   ;;  %v206_v1 = vmov 2   ;;  %v39_v2 = vld [vmem:[#allocation2] sm:$0xff]  ;;  %v207_v3 = vmov 1   ;;  %v47_v6 = vlaneseq }
  0x26   :  { %125 = vset.pattern.permute.xlu0 %v205_v0  ;;  %127 = vset.pattern.permute.xlu1 %v206_v1  ;;  %v208_v4 = vmov 3   ;;  %v209_v5 = vmov 4   ;;  %v40_v9 = vld [vmem:[#allocation5] sm:$0xff]  ;;  %v116_v18 = vld [vmem:[%s272_s2] ss:$0 sm:$0xff]  ;;  %s210_s9 = smov [#allocation7]  }
  0x27   :  { %44 = vperm.xlu0 %125, %v39_v2   ;;  %70 = vperm.xlu1 %127, %v39_v2   ;;  %v48_v7 = vshrl.u32 %v47_v6, 7  ;;  %s106_s10 = sshll.u32 %s210_s9, 4  ;;  %s107_s10 = int_to_ptr.vmem [resolvable:$true] %s106_s10 }
  0x28   :  { %s175_s2 = scalar_lea.vmem %s107_s10, 128  ;;  %p180_p3 = scmp.lt.s32.totalorder %s107_s10, %s107_s10 }
  0x29   :  { %v49_v8 = vsub.s32 0, %v48_v7  ;;  %v65_v11 = vsub.s32 1, %v48_v7  ;;  %v75_v13 = vsub.s32 2, %v48_v7  ;;  %v85_v17 = vsub.s32 3, %v48_v7  ;;  %p176_p2 = scmp.ne.s32.totalorder %s107_s10, %s175_s2  ;;  %p181_p4 = scmp.lt.s32.totalorder %s175_s2, %s175_s2 }
  0x2a   :  { %v95_v19 = vsub.s32 4, %v48_v7 }
  0x2b   :  { %126 = vset.pattern.permute.xlu0 %v207_v3  ;;  %128 = vset.pattern.permute.xlu1 %v208_v4  ;;  %v50_v10 = vrot.slane %v40_v9, %v49_v8  ;;  %v66_v16 = vrot.slane %v40_v9, %v65_v11  ;;  %v76_v20 = vrot.slane %v40_v9, %v75_v13  ;;  %p182_p5 = por %p181_p4, %p180_p3 }
  0x2c   :  { %60 = vperm.xlu0 %126, %v39_v2   ;;  %80 = vperm.xlu1 %128, %v39_v2   ;;  %v86_v25 = vrot.slane %v40_v9, %v85_v17  ;;  %v96_v26 = vrot.slane %v40_v9, %v95_v19 }
  0x2d   :  { %p183_p6 = pnand %p182_p5, %p176_p2 }
  0x30   :  { %129 = vset.pattern.permute.xlu1 %v209_v5  ;;  %130 = vset.pattern.permute.xlu0 %v209_v5 }
  0x31   :  { %90 = vperm.xlu1 %129, %v39_v2  }
  0xa6   :  { %v45_v12 = vpop.permute.xlu0 %44  ;;  %v71_v14 = vpop.permute.xlu1 %70 }
  0xa7   :  { %v51_v15 = vmul.f32 %v50_v10, %v45_v12  ;;  %v77_v27 = vmul.f32 %v76_v20, %v71_v14 }
  0xa9   :  { %v58_v23 = vadd.f32 %v116_v18, %v51_v15 }
  0xab   :  { %v61_v21 = vpop.permute.xlu0 %60  ;;  %v81_v22 = vpop.permute.xlu1 %80 }
  0xac   :  { %v67_v24 = vmul.f32 %v66_v16, %v61_v21  ;;  %v87_v30 = vmul.f32 %v86_v25, %v81_v22 }
  0xae   :  { %v68_v28 = vadd.f32 %v67_v24, %v58_v23 }
  0xb0   :  { %v78_v29 = vadd.f32 %v77_v27, %v68_v28  ;;  %v91_v31 = vpop.permute.xlu1 %90 }
  0xb1   :  { %v97_v32 = vmul.f32 %v96_v26, %v91_v31 }
  0xb2   :  { %v88_v33 = vadd.f32 %v87_v30, %v78_v29 }
  0xb4   :  { %v98_v34 = vadd.f32 %v97_v32, %v88_v33 }
  0xb6   :  { %99 = vst [vmem:[#allocation7] sm:$0xff] %v98_v34 }
  0xb7   :  { %186 = shalt.err (!%p183_p6)
}
  0xb8   :  { %s187_s13 = scalar_lea.hbm %s273_s3, 128 }
  0xb9   :  { %p188_p7 = scmp.ne.s32.totalorder %s273_s3, %s187_s13  ;;  %p191_p8 = scmp.lt.u32.totalorder %s187_s13, %s273_s3 }
  0xbb   :  { %p193_p9 = pnand %p191_p8, %p188_p7 }
  0xbd   :  { %196 = shalt.err (!%p193_p9)
}
  0xbe   :  { %109 = dma.vmem_to_hbm [thread:$0]  %s107_s10, 128, %s273_s3, [#allocation4]  }
  0xbf   :  { %201 = dma.done.wait [#allocation4], 128  }
  0xc0   :  { %202 = vsyncadd [#allocation4], 4294967168 }
  0xc1   :  { %113 = vsyncpa [#allocation3], 1 }
  0xc2   :  { %114 = vsyncpa [#allocation6], 1 }
  0xc3   :  { %115 = vsyncpa [#allocation4], 1 }

</bundles_post_ra>
